<compile_context>
chip_gen: v6e
topology: v6e:2x2x1
jax: 0.10.0
libtpu: 0.0.40
codegen_flags: <defaults>
</compile_context>

<pallas_src>
import jax
import jax.numpy as jnp
from jax import lax
from jax.experimental import pallas as pl
from jax.experimental.pallas import tpu as pltpu


def _bilstm_kernel(gx_ref, whh_ref, out_ref, h_scr, c_scr):
    """Recurrent part of the bidirectional LSTM; one (direction, time-block) step.

    gx_ref : (Tt, B, 4H)  precomputed x @ W_ih + (b_ih + b_hh) for this block
    whh_ref: (H, 4H)      hidden->gate weights for this direction
    out_ref: (Tt, B, H)   hidden states for this block (natural time order)
    h_scr, c_scr: (B, H)  recurrent state carried across time blocks
    """
    # Reset recurrent state at the start of each direction's time sweep
    # (time axis is grid axis 1, NOT axis 0 -- axis 0 is the direction).
    @pl.when(pl.program_id(1) == 0)
    def _():
        h_scr[...] = jnp.zeros_like(h_scr)
        c_scr[...] = jnp.zeros_like(c_scr)

    d = pl.program_id(0)          # 0 = forward, 1 = backward
    Tt = gx_ref.shape[0]
    H = h_scr.shape[-1]
    whh = whh_ref[...]            # hoist: reused across all Tt steps

    def step(i, carry):
        h_prev, c_prev = carry
        # Forward walks 0..Tt-1, backward walks Tt-1..0 within the block.
        t = d * (Tt - 1 - i) + (1 - d) * i
        gates = gx_ref[t] + jnp.dot(h_prev, whh,
                                    preferred_element_type=jnp.float32)
        # sigmoid(x) = 0.5*(tanh(x/2)+1): single EUP push per gate.
        i_g = 0.5 * (jnp.tanh(0.5 * gates[:, 0 * H:1 * H]) + 1.0)
        f_g = 0.5 * (jnp.tanh(0.5 * gates[:, 1 * H:2 * H]) + 1.0)
        g_g = jnp.tanh(gates[:, 2 * H:3 * H])
        o_g = 0.5 * (jnp.tanh(0.5 * gates[:, 3 * H:4 * H]) + 1.0)
        c_new = f_g * c_prev + i_g * g_g
        h_new = o_g * jnp.tanh(c_new)
        out_ref[t] = h_new
        return h_new, c_new

    h, c = lax.fori_loop(0, Tt, step, (h_scr[...], c_scr[...]), unroll=True)
    h_scr[...] = h
    c_scr[...] = c


def _pick_time_block(T, max_block=32):
    """Largest divisor of T that is <= max_block (keeps unrolled loop small)."""
    for tt in range(min(T, max_block), 0, -1):
        if T % tt == 0:
            return tt
    return 1


def simple_lstm_forward(x, params):
    """Bidirectional LSTM forward, matching nn.LSTM(nIn, nHidden, bidirectional=True).

    x: (T, B, nIn) float32
    params: dict with stacked direction-0/1 weights:
        wih: (2, nIn, 4H)   whh: (2, H, 4H)   b: (2, 4H)  (= b_ih + b_hh)
    returns: (T, B, 2*nHidden) float32
    """
    T, B, nIn = x.shape
    wih, whh, b = params["wih"], params["whh"], params["b"]
    H = whh.shape[-2]
    Tt = _pick_time_block(T)
    n_tb = T // Tt

    # --- Hoisted input projection: one tall MXU-efficient matmul over the whole
    # sequence (review opt #1), with the combined bias folded in here so the
    # recurrent kernel only does h_prev @ W_hh per step.
    gates_x = jnp.einsum("tbi,dif->dtbf", x, wih,
                         preferred_element_type=jnp.float32)
    gates_x = gates_x + b[:, None, None, :]          # (2, T, B, 4H)

    # Time-block index: forward walks blocks 0..n_tb-1, backward walks them in
    # reverse so its state sweep starts at t = T-1.
    def _tblk(d, tb):
        return d * (n_tb - 1 - tb) + (1 - d) * tb

    out = pl.pallas_call(
        _bilstm_kernel,
        out_shape=jax.ShapeDtypeStruct((2, T, B, H), jnp.float32),
        grid=(2, n_tb),
        in_specs=[
            # precomputed gate inputs, (Tt, B, 4H) slab per grid step
            pl.BlockSpec((None, Tt, B, 4 * H),
                         lambda d, tb: (d, _tblk(d, tb), 0, 0)),
            # per-direction hidden->gate weights (grid-invariant per direction)
            pl.BlockSpec((None, H, 4 * H), lambda d, tb: (d, 0, 0)),
        ],
        out_specs=pl.BlockSpec((None, Tt, B, H),
                               lambda d, tb: (d, _tblk(d, tb), 0, 0)),
        scratch_shapes=[
            pltpu.VMEM((B, H), jnp.float32),   # h
            pltpu.VMEM((B, H), jnp.float32),   # c
        ],
        compiler_params=pltpu.CompilerParams(
            # direction axis parallel (2 TCs on v7x), time axis sequential
            dimension_semantics=("parallel", "arbitrary")),
    )(gates_x, whh)

    # Merge the two directions along the feature axis (see TODO above).
    return jnp.concatenate([out[0], out[1]], axis=-1)


def init_params(key, nIn, nHidden):
    """Uniform(-1/sqrt(H), 1/sqrt(H)) init like PyTorch; weights pre-transposed
    and stacked over direction (0 = forward, 1 = reverse); b = b_ih + b_hh."""
    H = nHidden
    k = 1.0 / jnp.sqrt(jnp.float32(H))
    ks = jax.random.split(key, 8)

    def u(kk, shape):
        return jax.random.uniform(kk, shape, jnp.float32, -k, k)

    wih = jnp.stack([u(ks[0], (4 * H, nIn)).T, u(ks[4], (4 * H, nIn)).T])
    whh = jnp.stack([u(ks[1], (4 * H, H)).T, u(ks[5], (4 * H, H)).T])
    b = jnp.stack([u(ks[2], (4 * H,)) + u(ks[3], (4 * H,)),
                   u(ks[6], (4 * H,)) + u(ks[7], (4 * H,))])
    return dict(wih=wih, whh=whh, b=b)


def _reference_bilstm(x, params):
    """Pure-JAX reference (lax.scan) with PyTorch gate order i, f, g, o."""
    wih, whh, b = params["wih"], params["whh"], params["b"]
    H = whh.shape[-2]
    B = x.shape[1]

    def run(x_seq, d):
        def step(carry, xt):
            h, c = carry
            gates = xt @ wih[d] + h @ whh[d] + b[d]
            i_g = jax.nn.sigmoid(gates[:, 0 * H:1 * H])
            f_g = jax.nn.sigmoid(gates[:, 1 * H:2 * H])
            g_g = jnp.tanh(gates[:, 2 * H:3 * H])
            o_g = jax.nn.sigmoid(gates[:, 3 * H:4 * H])
            c = f_g * c + i_g * g_g
            h = o_g * jnp.tanh(c)
            return (h, c), h

        init = (jnp.zeros((B, H), jnp.float32), jnp.zeros((B, H), jnp.float32))
        _, hs = lax.scan(step, init, x_seq)
        return hs

    fwd = run(x, 0)
    bwd = run(x[::-1], 1)[::-1]
    return jnp.concatenate([fwd, bwd], axis=-1)


if __name__ == "__main__":
    T, B, nIn, nHidden = 8, 2, 16, 32

    key = jax.random.PRNGKey(0)
    k_x, k_p = jax.random.split(key)
    x = jax.random.normal(k_x, (T, B, nIn), jnp.float32)
    params = init_params(k_p, nIn, nHidden)

    out = jax.jit(simple_lstm_forward)(x, params)
    out = jax.block_until_ready(out)

    assert out.shape == (T, B, 2 * nHidden), out.shape
    assert out.dtype == jnp.float32

    ref = _reference_bilstm(x, params)
    err = float(jnp.max(jnp.abs(out - ref)))
    assert err < 1e-4, f"max abs error vs reference: {err}"

    print("KERNEL_OK")
</pallas_src>

<mosaic_0001>
module attributes {stable_mosaic.version = 11 : i64} {
  func.func @_bilstm_kernel(%arg0: i32, %arg1: i32, %arg2: memref<1x8x2x128xf32, #tpu.memory_space<vmem>>, %arg3: memref<1x32x128xf32, #tpu.memory_space<vmem>>, %arg4: memref<1x8x2x32xf32, #tpu.memory_space<vmem>>, %arg5: memref<2x32xf32, #tpu.memory_space<vmem>>, %arg6: memref<2x32xf32, #tpu.memory_space<vmem>>) attributes {dimension_semantics = [#tpu.dimension_semantics<parallel>, #tpu.dimension_semantics<arbitrary>], iteration_bounds = array<i64: 2, 1>, scalar_prefetch = 0 : i64, scratch_operands = 2 : i64, tpu.core_type = #tpu.core_type<tc>, window_params = [{transform_indices = @transform_0, window_bounds = array<i64: 1, 8, 2, 128>}, {transform_indices = @transform_1, window_bounds = array<i64: 1, 32, 128>}, {transform_indices = @transform_2, window_bounds = array<i64: 1, 8, 2, 32>}]} {
    %c0_i32 = arith.constant 0 : i32
    %0 = arith.cmpi eq, %arg1, %c0_i32 : i32
    %1 = arith.extui %0 : i1 to i32
    %c0_i32_0 = arith.constant 0 : i32
    %2 = arith.cmpi ne, %1, %c0_i32_0 : i32
    scf.if %2 {
      %cst_155 = arith.constant 0.000000e+00 : f32
      %369 = vector.broadcast %cst_155 : f32 to vector<2x32xf32>
      %c0_156 = arith.constant 0 : index
      %c0_157 = arith.constant 0 : index
      %370 = vector.load %arg5[%c0_156, %c0_157] : memref<2x32xf32, #tpu.memory_space<vmem>>, vector<2x32xf32>
      tpu.vector_store %arg5[%c0_156, %c0_157], %369 {strides = array<i32>} : memref<2x32xf32, #tpu.memory_space<vmem>>, vector<2x32xf32>,
      %cst_158 = arith.constant 0.000000e+00 : f32
      %371 = vector.broadcast %cst_158 : f32 to vector<2x32xf32>
      %c0_159 = arith.constant 0 : index
      %c0_160 = arith.constant 0 : index
      %372 = vector.load %arg6[%c0_159, %c0_160] : memref<2x32xf32, #tpu.memory_space<vmem>>, vector<2x32xf32>
      tpu.vector_store %arg6[%c0_159, %c0_160], %371 {strides = array<i32>} : memref<2x32xf32, #tpu.memory_space<vmem>>, vector<2x32xf32>,
    } else {
    }
    %c0 = arith.constant 0 : index
    %c0_1 = arith.constant 0 : index
    %c0_2 = arith.constant 0 : index
    %3 = vector.load %arg3[%c0, %c0_1, %c0_2] : memref<1x32x128xf32, #tpu.memory_space<vmem>>, vector<1x32x128xf32>
    %4 = vector.shape_cast %3 : vector<1x32x128xf32> to vector<32x128xf32>
    %c0_3 = arith.constant 0 : index
    %c0_4 = arith.constant 0 : index
    %5 = vector.load %arg5[%c0_3, %c0_4] : memref<2x32xf32, #tpu.memory_space<vmem>>, vector<2x32xf32>
    %c0_5 = arith.constant 0 : index
    %c0_6 = arith.constant 0 : index
    %6 = vector.load %arg6[%c0_5, %c0_6] : memref<2x32xf32, #tpu.memory_space<vmem>>, vector<2x32xf32>
    %c0_i32_7 = arith.constant 0 : i32
    %c7_i32 = arith.constant 7 : i32
    %7 = arith.subi %c7_i32, %c0_i32_7 : i32
    %8 = arith.muli %arg0, %7 : i32
    %c1_i32 = arith.constant 1 : i32
    %9 = arith.subi %c1_i32, %arg0 : i32
    %10 = arith.muli %9, %c0_i32_7 : i32
    %11 = arith.addi %8, %10 : i32
    %c0_8 = arith.constant 0 : index
    %12 = arith.index_cast %11 : i32 to index
    %c0_9 = arith.constant 0 : index
    %c0_10 = arith.constant 0 : index
    %13 = vector.load %arg2[%c0_8, %12, %c0_9, %c0_10] : memref<1x8x2x128xf32, #tpu.memory_space<vmem>>, vector<1x1x2x128xf32>
    %14 = vector.shape_cast %13 : vector<1x1x2x128xf32> to vector<2x128xf32>
    %cst = arith.constant dense<0.000000e+00> : vector<2x128xf32>
    %15 = tpu.matmul %5, %4, %cst {dimension_numbers = #tpu.dot_dimension_numbers<[1], [0], [0], [1], [0, 0, 1, 1], [], []>} : vector<2x32xf32>, vector<32x128xf32>, vector<2x128xf32> -> vector<2x128xf32>
    %16 = arith.addf %14, %15 : vector<2x128xf32>
    %17 = vector.extract_strided_slice %16 {offsets = [0, 0], sizes = [2, 32], strides = [1, 1]} : vector<2x128xf32> to vector<2x32xf32>
    %cst_11 = arith.constant 5.000000e-01 : f32
    %18 = vector.broadcast %cst_11 : f32 to vector<2x32xf32>
    %19 = arith.mulf %18, %17 : vector<2x32xf32>
    %20 = math.tanh %19 : vector<2x32xf32>
    %cst_12 = arith.constant 1.000000e+00 : f32
    %21 = vector.broadcast %cst_12 : f32 to vector<2x32xf32>
    %22 = arith.addf %20, %21 : vector<2x32xf32>
    %cst_13 = arith.constant 5.000000e-01 : f32
    %23 = vector.broadcast %cst_13 : f32 to vector<2x32xf32>
    %24 = arith.mulf %23, %22 : vector<2x32xf32>
    %25 = vector.extract_strided_slice %16 {offsets = [0, 32], sizes = [2, 32], strides = [1, 1]} : vector<2x128xf32> to vector<2x32xf32>
    %cst_14 = arith.constant 5.000000e-01 : f32
    %26 = vector.broadcast %cst_14 : f32 to vector<2x32xf32>
    %27 = arith.mulf %26, %25 : vector<2x32xf32>
    %28 = math.tanh %27 : vector<2x32xf32>
    %cst_15 = arith.constant 1.000000e+00 : f32
    %29 = vector.broadcast %cst_15 : f32 to vector<2x32xf32>
    %30 = arith.addf %28, %29 : vector<2x32xf32>
    %cst_16 = arith.constant 5.000000e-01 : f32
    %31 = vector.broadcast %cst_16 : f32 to vector<2x32xf32>
    %32 = arith.mulf %31, %30 : vector<2x32xf32>
    %33 = vector.extract_strided_slice %16 {offsets = [0, 64], sizes = [2, 32], strides = [1, 1]} : vector<2x128xf32> to vector<2x32xf32>
    %34 = math.tanh %33 : vector<2x32xf32>
    %35 = vector.extract_strided_slice %16 {offsets = [0, 96], sizes = [2, 32], strides = [1, 1]} : vector<2x128xf32> to vector<2x32xf32>
    %cst_17 = arith.constant 5.000000e-01 : f32
    %36 = vector.broadcast %cst_17 : f32 to vector<2x32xf32>
    %37 = arith.mulf %36, %35 : vector<2x32xf32>
    %38 = math.tanh %37 : vector<2x32xf32>
    %cst_18 = arith.constant 1.000000e+00 : f32
    %39 = vector.broadcast %cst_18 : f32 to vector<2x32xf32>
    %40 = arith.addf %38, %39 : vector<2x32xf32>
    %cst_19 = arith.constant 5.000000e-01 : f32
    %41 = vector.broadcast %cst_19 : f32 to vector<2x32xf32>
    %42 = arith.mulf %41, %40 : vector<2x32xf32>
    %43 = arith.mulf %32, %6 : vector<2x32xf32>
    %44 = arith.mulf %24, %34 : vector<2x32xf32>
    %45 = arith.addf %43, %44 : vector<2x32xf32>
    %46 = math.tanh %45 : vector<2x32xf32>
    %47 = arith.mulf %42, %46 : vector<2x32xf32>
    %c0_20 = arith.constant 0 : index
    %48 = arith.index_cast %11 : i32 to index
    %c0_21 = arith.constant 0 : index
    %c0_22 = arith.constant 0 : index
    %49 = vector.load %arg4[%c0_20, %48, %c0_21, %c0_22] : memref<1x8x2x32xf32, #tpu.memory_space<vmem>>, vector<1x1x2x32xf32>
    %50 = vector.shape_cast %49 : vector<1x1x2x32xf32> to vector<2x32xf32>
    %51 = vector.shape_cast %47 : vector<2x32xf32> to vector<1x1x2x32xf32>
    tpu.vector_store %arg4[%c0_20, %48, %c0_21, %c0_22], %51 {strides = array<i32>} : memref<1x8x2x32xf32, #tpu.memory_space<vmem>>, vector<1x1x2x32xf32>,
    %c1_i32_23 = arith.constant 1 : i32
    %c7_i32_24 = arith.constant 7 : i32
    %52 = arith.subi %c7_i32_24, %c1_i32_23 : i32
    %53 = arith.muli %arg0, %52 : i32
    %c1_i32_25 = arith.constant 1 : i32
    %54 = arith.subi %c1_i32_25, %arg0 : i32
    %55 = arith.muli %54, %c1_i32_23 : i32
    %56 = arith.addi %53, %55 : i32
    %c0_26 = arith.constant 0 : index
    %57 = arith.index_cast %56 : i32 to index
    %c0_27 = arith.constant 0 : index
    %c0_28 = arith.constant 0 : index
    %58 = vector.load %arg2[%c0_26, %57, %c0_27, %c0_28] : memref<1x8x2x128xf32, #tpu.memory_space<vmem>>, vector<1x1x2x128xf32>
    %59 = vector.shape_cast %58 : vector<1x1x2x128xf32> to vector<2x128xf32>
    %cst_29 = arith.constant dense<0.000000e+00> : vector<2x128xf32>
    %60 = tpu.matmul %47, %4, %cst_29 {dimension_numbers = #tpu.dot_dimension_numbers<[1], [0], [0], [1], [0, 0, 1, 1], [], []>} : vector<2x32xf32>, vector<32x128xf32>, vector<2x128xf32> -> vector<2x128xf32>
    %61 = arith.addf %59, %60 : vector<2x128xf32>
    %62 = vector.extract_strided_slice %61 {offsets = [0, 0], sizes = [2, 32], strides = [1, 1]} : vector<2x128xf32> to vector<2x32xf32>
    %cst_30 = arith.constant 5.000000e-01 : f32
    %63 = vector.broadcast %cst_30 : f32 to vector<2x32xf32>
    %64 = arith.mulf %63, %62 : vector<2x32xf32>
    %65 = math.tanh %64 : vector<2x32xf32>
    %cst_31 = arith.constant 1.000000e+00 : f32
    %66 = vector.broadcast %cst_31 : f32 to vector<2x32xf32>
    %67 = arith.addf %65, %66 : vector<2x32xf32>
    %cst_32 = arith.constant 5.000000e-01 : f32
    %68 = vector.broadcast %cst_32 : f32 to vector<2x32xf32>
    %69 = arith.mulf %68, %67 : vector<2x32xf32>
    %70 = vector.extract_strided_slice %61 {offsets = [0, 32], sizes = [2, 32], strides = [1, 1]} : vector<2x128xf32> to vector<2x32xf32>
    %cst_33 = arith.constant 5.000000e-01 : f32
    %71 = vector.broadcast %cst_33 : f32 to vector<2x32xf32>
    %72 = arith.mulf %71, %70 : vector<2x32xf32>
    %73 = math.tanh %72 : vector<2x32xf32>
    %cst_34 = arith.constant 1.000000e+00 : f32
    %74 = vector.broadcast %cst_34 : f32 to vector<2x32xf32>
    %75 = arith.addf %73, %74 : vector<2x32xf32>
    %cst_35 = arith.constant 5.000000e-01 : f32
    %76 = vector.broadcast %cst_35 : f32 to vector<2x32xf32>
    %77 = arith.mulf %76, %75 : vector<2x32xf32>
    %78 = vector.extract_strided_slice %61 {offsets = [0, 64], sizes = [2, 32], strides = [1, 1]} : vector<2x128xf32> to vector<2x32xf32>
    %79 = math.tanh %78 : vector<2x32xf32>
    %80 = vector.extract_strided_slice %61 {offsets = [0, 96], sizes = [2, 32], strides = [1, 1]} : vector<2x128xf32> to vector<2x32xf32>
    %cst_36 = arith.constant 5.000000e-01 : f32
    %81 = vector.broadcast %cst_36 : f32 to vector<2x32xf32>
    %82 = arith.mulf %81, %80 : vector<2x32xf32>
    %83 = math.tanh %82 : vector<2x32xf32>
    %cst_37 = arith.constant 1.000000e+00 : f32
    %84 = vector.broadcast %cst_37 : f32 to vector<2x32xf32>
    %85 = arith.addf %83, %84 : vector<2x32xf32>
    %cst_38 = arith.constant 5.000000e-01 : f32
    %86 = vector.broadcast %cst_38 : f32 to vector<2x32xf32>
    %87 = arith.mulf %86, %85 : vector<2x32xf32>
    %88 = arith.mulf %77, %45 : vector<2x32xf32>
    %89 = arith.mulf %69, %79 : vector<2x32xf32>
    %90 = arith.addf %88, %89 : vector<2x32xf32>
    %91 = math.tanh %90 : vector<2x32xf32>
    %92 = arith.mulf %87, %91 : vector<2x32xf32>
    %c0_39 = arith.constant 0 : index
    %93 = arith.index_cast %56 : i32 to index
    %c0_40 = arith.constant 0 : index
    %c0_41 = arith.constant 0 : index
    %94 = vector.load %arg4[%c0_39, %93, %c0_40, %c0_41] : memref<1x8x2x32xf32, #tpu.memory_space<vmem>>, vector<1x1x2x32xf32>
    %95 = vector.shape_cast %94 : vector<1x1x2x32xf32> to vector<2x32xf32>
    %96 = vector.shape_cast %92 : vector<2x32xf32> to vector<1x1x2x32xf32>
    tpu.vector_store %arg4[%c0_39, %93, %c0_40, %c0_41], %96 {strides = array<i32>} : memref<1x8x2x32xf32, #tpu.memory_space<vmem>>, vector<1x1x2x32xf32>,
    %c2_i32 = arith.constant 2 : i32
    %c7_i32_42 = arith.constant 7 : i32
    %97 = arith.subi %c7_i32_42, %c2_i32 : i32
    %98 = arith.muli %arg0, %97 : i32
    %c1_i32_43 = arith.constant 1 : i32
    %99 = arith.subi %c1_i32_43, %arg0 : i32
    %100 = arith.muli %99, %c2_i32 : i32
    %101 = arith.addi %98, %100 : i32
    %c0_44 = arith.constant 0 : index
    %102 = arith.index_cast %101 : i32 to index
    %c0_45 = arith.constant 0 : index
    %c0_46 = arith.constant 0 : index
    %103 = vector.load %arg2[%c0_44, %102, %c0_45, %c0_46] : memref<1x8x2x128xf32, #tpu.memory_space<vmem>>, vector<1x1x2x128xf32>
    %104 = vector.shape_cast %103 : vector<1x1x2x128xf32> to vector<2x128xf32>
    %cst_47 = arith.constant dense<0.000000e+00> : vector<2x128xf32>
    %105 = tpu.matmul %92, %4, %cst_47 {dimension_numbers = #tpu.dot_dimension_numbers<[1], [0], [0], [1], [0, 0, 1, 1], [], []>} : vector<2x32xf32>, vector<32x128xf32>, vector<2x128xf32> -> vector<2x128xf32>
    %106 = arith.addf %104, %105 : vector<2x128xf32>
    %107 = vector.extract_strided_slice %106 {offsets = [0, 0], sizes = [2, 32], strides = [1, 1]} : vector<2x128xf32> to vector<2x32xf32>
    %cst_48 = arith.constant 5.000000e-01 : f32
    %108 = vector.broadcast %cst_48 : f32 to vector<2x32xf32>
    %109 = arith.mulf %108, %107 : vector<2x32xf32>
    %110 = math.tanh %109 : vector<2x32xf32>
    %cst_49 = arith.constant 1.000000e+00 : f32
    %111 = vector.broadcast %cst_49 : f32 to vector<2x32xf32>
    %112 = arith.addf %110, %111 : vector<2x32xf32>
    %cst_50 = arith.constant 5.000000e-01 : f32
    %113 = vector.broadcast %cst_50 : f32 to vector<2x32xf32>
    %114 = arith.mulf %113, %112 : vector<2x32xf32>
    %115 = vector.extract_strided_slice %106 {offsets = [0, 32], sizes = [2, 32], strides = [1, 1]} : vector<2x128xf32> to vector<2x32xf32>
    %cst_51 = arith.constant 5.000000e-01 : f32
    %116 = vector.broadcast %cst_51 : f32 to vector<2x32xf32>
    %117 = arith.mulf %116, %115 : vector<2x32xf32>
    %118 = math.tanh %117 : vector<2x32xf32>
    %cst_52 = arith.constant 1.000000e+00 : f32
    %119 = vector.broadcast %cst_52 : f32 to vector<2x32xf32>
    %120 = arith.addf %118, %119 : vector<2x32xf32>
    %cst_53 = arith.constant 5.000000e-01 : f32
    %121 = vector.broadcast %cst_53 : f32 to vector<2x32xf32>
    %122 = arith.mulf %121, %120 : vector<2x32xf32>
    %123 = vector.extract_strided_slice %106 {offsets = [0, 64], sizes = [2, 32], strides = [1, 1]} : vector<2x128xf32> to vector<2x32xf32>
    %124 = math.tanh %123 : vector<2x32xf32>
    %125 = vector.extract_strided_slice %106 {offsets = [0, 96], sizes = [2, 32], strides = [1, 1]} : vector<2x128xf32> to vector<2x32xf32>
    %cst_54 = arith.constant 5.000000e-01 : f32
    %126 = vector.broadcast %cst_54 : f32 to vector<2x32xf32>
    %127 = arith.mulf %126, %125 : vector<2x32xf32>
    %128 = math.tanh %127 : vector<2x32xf32>
    %cst_55 = arith.constant 1.000000e+00 : f32
    %129 = vector.broadcast %cst_55 : f32 to vector<2x32xf32>
    %130 = arith.addf %128, %129 : vector<2x32xf32>
    %cst_56 = arith.constant 5.000000e-01 : f32
    %131 = vector.broadcast %cst_56 : f32 to vector<2x32xf32>
    %132 = arith.mulf %131, %130 : vector<2x32xf32>
    %133 = arith.mulf %122, %90 : vector<2x32xf32>
    %134 = arith.mulf %114, %124 : vector<2x32xf32>
    %135 = arith.addf %133, %134 : vector<2x32xf32>
    %136 = math.tanh %135 : vector<2x32xf32>
    %137 = arith.mulf %132, %136 : vector<2x32xf32>
    %c0_57 = arith.constant 0 : index
    %138 = arith.index_cast %101 : i32 to index
    %c0_58 = arith.constant 0 : index
    %c0_59 = arith.constant 0 : index
    %139 = vector.load %arg4[%c0_57, %138, %c0_58, %c0_59] : memref<1x8x2x32xf32, #tpu.memory_space<vmem>>, vector<1x1x2x32xf32>
    %140 = vector.shape_cast %139 : vector<1x1x2x32xf32> to vector<2x32xf32>
    %141 = vector.shape_cast %137 : vector<2x32xf32> to vector<1x1x2x32xf32>
    tpu.vector_store %arg4[%c0_57, %138, %c0_58, %c0_59], %141 {strides = array<i32>} : memref<1x8x2x32xf32, #tpu.memory_space<vmem>>, vector<1x1x2x32xf32>,
    %c3_i32 = arith.constant 3 : i32
    %c7_i32_60 = arith.constant 7 : i32
    %142 = arith.subi %c7_i32_60, %c3_i32 : i32
    %143 = arith.muli %arg0, %142 : i32
    %c1_i32_61 = arith.constant 1 : i32
    %144 = arith.subi %c1_i32_61, %arg0 : i32
    %145 = arith.muli %144, %c3_i32 : i32
    %146 = arith.addi %143, %145 : i32
    %c0_62 = arith.constant 0 : index
    %147 = arith.index_cast %146 : i32 to index
    %c0_63 = arith.constant 0 : index
    %c0_64 = arith.constant 0 : index
    %148 = vector.load %arg2[%c0_62, %147, %c0_63, %c0_64] : memref<1x8x2x128xf32, #tpu.memory_space<vmem>>, vector<1x1x2x128xf32>
    %149 = vector.shape_cast %148 : vector<1x1x2x128xf32> to vector<2x128xf32>
    %cst_65 = arith.constant dense<0.000000e+00> : vector<2x128xf32>
    %150 = tpu.matmul %137, %4, %cst_65 {dimension_numbers = #tpu.dot_dimension_numbers<[1], [0], [0], [1], [0, 0, 1, 1], [], []>} : vector<2x32xf32>, vector<32x128xf32>, vector<2x128xf32> -> vector<2x128xf32>
    %151 = arith.addf %149, %150 : vector<2x128xf32>
    %152 = vector.extract_strided_slice %151 {offsets = [0, 0], sizes = [2, 32], strides = [1, 1]} : vector<2x128xf32> to vector<2x32xf32>
    %cst_66 = arith.constant 5.000000e-01 : f32
    %153 = vector.broadcast %cst_66 : f32 to vector<2x32xf32>
    %154 = arith.mulf %153, %152 : vector<2x32xf32>
    %155 = math.tanh %154 : vector<2x32xf32>
    %cst_67 = arith.constant 1.000000e+00 : f32
    %156 = vector.broadcast %cst_67 : f32 to vector<2x32xf32>
    %157 = arith.addf %155, %156 : vector<2x32xf32>
    %cst_68 = arith.constant 5.000000e-01 : f32
    %158 = vector.broadcast %cst_68 : f32 to vector<2x32xf32>
    %159 = arith.mulf %158, %157 : vector<2x32xf32>
    %160 = vector.extract_strided_slice %151 {offsets = [0, 32], sizes = [2, 32], strides = [1, 1]} : vector<2x128xf32> to vector<2x32xf32>
    %cst_69 = arith.constant 5.000000e-01 : f32
    %161 = vector.broadcast %cst_69 : f32 to vector<2x32xf32>
    %162 = arith.mulf %161, %160 : vector<2x32xf32>
    %163 = math.tanh %162 : vector<2x32xf32>
    %cst_70 = arith.constant 1.000000e+00 : f32
    %164 = vector.broadcast %cst_70 : f32 to vector<2x32xf32>
    %165 = arith.addf %163, %164 : vector<2x32xf32>
    %cst_71 = arith.constant 5.000000e-01 : f32
    %166 = vector.broadcast %cst_71 : f32 to vector<2x32xf32>
    %167 = arith.mulf %166, %165 : vector<2x32xf32>
    %168 = vector.extract_strided_slice %151 {offsets = [0, 64], sizes = [2, 32], strides = [1, 1]} : vector<2x128xf32> to vector<2x32xf32>
    %169 = math.tanh %168 : vector<2x32xf32>
    %170 = vector.extract_strided_slice %151 {offsets = [0, 96], sizes = [2, 32], strides = [1, 1]} : vector<2x128xf32> to vector<2x32xf32>
    %cst_72 = arith.constant 5.000000e-01 : f32
    %171 = vector.broadcast %cst_72 : f32 to vector<2x32xf32>
    %172 = arith.mulf %171, %170 : vector<2x32xf32>
    %173 = math.tanh %172 : vector<2x32xf32>
    %cst_73 = arith.constant 1.000000e+00 : f32
    %174 = vector.broadcast %cst_73 : f32 to vector<2x32xf32>
    %175 = arith.addf %173, %174 : vector<2x32xf32>
    %cst_74 = arith.constant 5.000000e-01 : f32
    %176 = vector.broadcast %cst_74 : f32 to vector<2x32xf32>
    %177 = arith.mulf %176, %175 : vector<2x32xf32>
    %178 = arith.mulf %167, %135 : vector<2x32xf32>
    %179 = arith.mulf %159, %169 : vector<2x32xf32>
    %180 = arith.addf %178, %179 : vector<2x32xf32>
    %181 = math.tanh %180 : vector<2x32xf32>
    %182 = arith.mulf %177, %181 : vector<2x32xf32>
    %c0_75 = arith.constant 0 : index
    %183 = arith.index_cast %146 : i32 to index
    %c0_76 = arith.constant 0 : index
    %c0_77 = arith.constant 0 : index
    %184 = vector.load %arg4[%c0_75, %183, %c0_76, %c0_77] : memref<1x8x2x32xf32, #tpu.memory_space<vmem>>, vector<1x1x2x32xf32>
    %185 = vector.shape_cast %184 : vector<1x1x2x32xf32> to vector<2x32xf32>
    %186 = vector.shape_cast %182 : vector<2x32xf32> to vector<1x1x2x32xf32>
    tpu.vector_store %arg4[%c0_75, %183, %c0_76, %c0_77], %186 {strides = array<i32>} : memref<1x8x2x32xf32, #tpu.memory_space<vmem>>, vector<1x1x2x32xf32>,
    %c4_i32 = arith.constant 4 : i32
    %c7_i32_78 = arith.constant 7 : i32
    %187 = arith.subi %c7_i32_78, %c4_i32 : i32
    %188 = arith.muli %arg0, %187 : i32
    %c1_i32_79 = arith.constant 1 : i32
    %189 = arith.subi %c1_i32_79, %arg0 : i32
    %190 = arith.muli %189, %c4_i32 : i32
    %191 = arith.addi %188, %190 : i32
    %c0_80 = arith.constant 0 : index
    %192 = arith.index_cast %191 : i32 to index
    %c0_81 = arith.constant 0 : index
    %c0_82 = arith.constant 0 : index
    %193 = vector.load %arg2[%c0_80, %192, %c0_81, %c0_82] : memref<1x8x2x128xf32, #tpu.memory_space<vmem>>, vector<1x1x2x128xf32>
    %194 = vector.shape_cast %193 : vector<1x1x2x128xf32> to vector<2x128xf32>
    %cst_83 = arith.constant dense<0.000000e+00> : vector<2x128xf32>
    %195 = tpu.matmul %182, %4, %cst_83 {dimension_numbers = #tpu.dot_dimension_numbers<[1], [0], [0], [1], [0, 0, 1, 1], [], []>} : vector<2x32xf32>, vector<32x128xf32>, vector<2x128xf32> -> vector<2x128xf32>
    %196 = arith.addf %194, %195 : vector<2x128xf32>
    %197 = vector.extract_strided_slice %196 {offsets = [0, 0], sizes = [2, 32], strides = [1, 1]} : vector<2x128xf32> to vector<2x32xf32>
    %cst_84 = arith.constant 5.000000e-01 : f32
    %198 = vector.broadcast %cst_84 : f32 to vector<2x32xf32>
    %199 = arith.mulf %198, %197 : vector<2x32xf32>
    %200 = math.tanh %199 : vector<2x32xf32>
    %cst_85 = arith.constant 1.000000e+00 : f32
    %201 = vector.broadcast %cst_85 : f32 to vector<2x32xf32>
    %202 = arith.addf %200, %201 : vector<2x32xf32>
    %cst_86 = arith.constant 5.000000e-01 : f32
    %203 = vector.broadcast %cst_86 : f32 to vector<2x32xf32>
    %204 = arith.mulf %203, %202 : vector<2x32xf32>
    %205 = vector.extract_strided_slice %196 {offsets = [0, 32], sizes = [2, 32], strides = [1, 1]} : vector<2x128xf32> to vector<2x32xf32>
    %cst_87 = arith.constant 5.000000e-01 : f32
    %206 = vector.broadcast %cst_87 : f32 to vector<2x32xf32>
    %207 = arith.mulf %206, %205 : vector<2x32xf32>
    %208 = math.tanh %207 : vector<2x32xf32>
    %cst_88 = arith.constant 1.000000e+00 : f32
    %209 = vector.broadcast %cst_88 : f32 to vector<2x32xf32>
    %210 = arith.addf %208, %209 : vector<2x32xf32>
    %cst_89 = arith.constant 5.000000e-01 : f32
    %211 = vector.broadcast %cst_89 : f32 to vector<2x32xf32>
    %212 = arith.mulf %211, %210 : vector<2x32xf32>
    %213 = vector.extract_strided_slice %196 {offsets = [0, 64], sizes = [2, 32], strides = [1, 1]} : vector<2x128xf32> to vector<2x32xf32>
    %214 = math.tanh %213 : vector<2x32xf32>
    %215 = vector.extract_strided_slice %196 {offsets = [0, 96], sizes = [2, 32], strides = [1, 1]} : vector<2x128xf32> to vector<2x32xf32>
    %cst_90 = arith.constant 5.000000e-01 : f32
    %216 = vector.broadcast %cst_90 : f32 to vector<2x32xf32>
    %217 = arith.mulf %216, %215 : vector<2x32xf32>
    %218 = math.tanh %217 : vector<2x32xf32>
    %cst_91 = arith.constant 1.000000e+00 : f32
    %219 = vector.broadcast %cst_91 : f32 to vector<2x32xf32>
    %220 = arith.addf %218, %219 : vector<2x32xf32>
    %cst_92 = arith.constant 5.000000e-01 : f32
    %221 = vector.broadcast %cst_92 : f32 to vector<2x32xf32>
    %222 = arith.mulf %221, %220 : vector<2x32xf32>
    %223 = arith.mulf %212, %180 : vector<2x32xf32>
    %224 = arith.mulf %204, %214 : vector<2x32xf32>
    %225 = arith.addf %223, %224 : vector<2x32xf32>
    %226 = math.tanh %225 : vector<2x32xf32>
    %227 = arith.mulf %222, %226 : vector<2x32xf32>
    %c0_93 = arith.constant 0 : index
    %228 = arith.index_cast %191 : i32 to index
    %c0_94 = arith.constant 0 : index
    %c0_95 = arith.constant 0 : index
    %229 = vector.load %arg4[%c0_93, %228, %c0_94, %c0_95] : memref<1x8x2x32xf32, #tpu.memory_space<vmem>>, vector<1x1x2x32xf32>
    %230 = vector.shape_cast %229 : vector<1x1x2x32xf32> to vector<2x32xf32>
    %231 = vector.shape_cast %227 : vector<2x32xf32> to vector<1x1x2x32xf32>
    tpu.vector_store %arg4[%c0_93, %228, %c0_94, %c0_95], %231 {strides = array<i32>} : memref<1x8x2x32xf32, #tpu.memory_space<vmem>>, vector<1x1x2x32xf32>,
    %c5_i32 = arith.constant 5 : i32
    %c7_i32_96 = arith.constant 7 : i32
    %232 = arith.subi %c7_i32_96, %c5_i32 : i32
    %233 = arith.muli %arg0, %232 : i32
    %c1_i32_97 = arith.constant 1 : i32
    %234 = arith.subi %c1_i32_97, %arg0 : i32
    %235 = arith.muli %234, %c5_i32 : i32
    %236 = arith.addi %233, %235 : i32
    %c0_98 = arith.constant 0 : index
    %237 = arith.index_cast %236 : i32 to index
    %c0_99 = arith.constant 0 : index
    %c0_100 = arith.constant 0 : index
    %238 = vector.load %arg2[%c0_98, %237, %c0_99, %c0_100] : memref<1x8x2x128xf32, #tpu.memory_space<vmem>>, vector<1x1x2x128xf32>
    %239 = vector.shape_cast %238 : vector<1x1x2x128xf32> to vector<2x128xf32>
    %cst_101 = arith.constant dense<0.000000e+00> : vector<2x128xf32>
    %240 = tpu.matmul %227, %4, %cst_101 {dimension_numbers = #tpu.dot_dimension_numbers<[1], [0], [0], [1], [0, 0, 1, 1], [], []>} : vector<2x32xf32>, vector<32x128xf32>, vector<2x128xf32> -> vector<2x128xf32>
    %241 = arith.addf %239, %240 : vector<2x128xf32>
    %242 = vector.extract_strided_slice %241 {offsets = [0, 0], sizes = [2, 32], strides = [1, 1]} : vector<2x128xf32> to vector<2x32xf32>
    %cst_102 = arith.constant 5.000000e-01 : f32
    %243 = vector.broadcast %cst_102 : f32 to vector<2x32xf32>
    %244 = arith.mulf %243, %242 : vector<2x32xf32>
    %245 = math.tanh %244 : vector<2x32xf32>
    %cst_103 = arith.constant 1.000000e+00 : f32
    %246 = vector.broadcast %cst_103 : f32 to vector<2x32xf32>
    %247 = arith.addf %245, %246 : vector<2x32xf32>
    %cst_104 = arith.constant 5.000000e-01 : f32
    %248 = vector.broadcast %cst_104 : f32 to vector<2x32xf32>
    %249 = arith.mulf %248, %247 : vector<2x32xf32>
    %250 = vector.extract_strided_slice %241 {offsets = [0, 32], sizes = [2, 32], strides = [1, 1]} : vector<2x128xf32> to vector<2x32xf32>
    %cst_105 = arith.constant 5.000000e-01 : f32
    %251 = vector.broadcast %cst_105 : f32 to vector<2x32xf32>
    %252 = arith.mulf %251, %250 : vector<2x32xf32>
    %253 = math.tanh %252 : vector<2x32xf32>
    %cst_106 = arith.constant 1.000000e+00 : f32
    %254 = vector.broadcast %cst_106 : f32 to vector<2x32xf32>
    %255 = arith.addf %253, %254 : vector<2x32xf32>
    %cst_107 = arith.constant 5.000000e-01 : f32
    %256 = vector.broadcast %cst_107 : f32 to vector<2x32xf32>
    %257 = arith.mulf %256, %255 : vector<2x32xf32>
    %258 = vector.extract_strided_slice %241 {offsets = [0, 64], sizes = [2, 32], strides = [1, 1]} : vector<2x128xf32> to vector<2x32xf32>
    %259 = math.tanh %258 : vector<2x32xf32>
    %260 = vector.extract_strided_slice %241 {offsets = [0, 96], sizes = [2, 32], strides = [1, 1]} : vector<2x128xf32> to vector<2x32xf32>
    %cst_108 = arith.constant 5.000000e-01 : f32
    %261 = vector.broadcast %cst_108 : f32 to vector<2x32xf32>
    %262 = arith.mulf %261, %260 : vector<2x32xf32>
    %263 = math.tanh %262 : vector<2x32xf32>
    %cst_109 = arith.constant 1.000000e+00 : f32
    %264 = vector.broadcast %cst_109 : f32 to vector<2x32xf32>
    %265 = arith.addf %263, %264 : vector<2x32xf32>
    %cst_110 = arith.constant 5.000000e-01 : f32
    %266 = vector.broadcast %cst_110 : f32 to vector<2x32xf32>
    %267 = arith.mulf %266, %265 : vector<2x32xf32>
    %268 = arith.mulf %257, %225 : vector<2x32xf32>
    %269 = arith.mulf %249, %259 : vector<2x32xf32>
    %270 = arith.addf %268, %269 : vector<2x32xf32>
    %271 = math.tanh %270 : vector<2x32xf32>
    %272 = arith.mulf %267, %271 : vector<2x32xf32>
    %c0_111 = arith.constant 0 : index
    %273 = arith.index_cast %236 : i32 to index
    %c0_112 = arith.constant 0 : index
    %c0_113 = arith.constant 0 : index
    %274 = vector.load %arg4[%c0_111, %273, %c0_112, %c0_113] : memref<1x8x2x32xf32, #tpu.memory_space<vmem>>, vector<1x1x2x32xf32>
    %275 = vector.shape_cast %274 : vector<1x1x2x32xf32> to vector<2x32xf32>
    %276 = vector.shape_cast %272 : vector<2x32xf32> to vector<1x1x2x32xf32>
    tpu.vector_store %arg4[%c0_111, %273, %c0_112, %c0_113], %276 {strides = array<i32>} : memref<1x8x2x32xf32, #tpu.memory_space<vmem>>, vector<1x1x2x32xf32>,
    %c6_i32 = arith.constant 6 : i32
    %c7_i32_114 = arith.constant 7 : i32
    %277 = arith.subi %c7_i32_114, %c6_i32 : i32
    %278 = arith.muli %arg0, %277 : i32
    %c1_i32_115 = arith.constant 1 : i32
    %279 = arith.subi %c1_i32_115, %arg0 : i32
    %280 = arith.muli %279, %c6_i32 : i32
    %281 = arith.addi %278, %280 : i32
    %c0_116 = arith.constant 0 : index
    %282 = arith.index_cast %281 : i32 to index
    %c0_117 = arith.constant 0 : index
    %c0_118 = arith.constant 0 : index
    %283 = vector.load %arg2[%c0_116, %282, %c0_117, %c0_118] : memref<1x8x2x128xf32, #tpu.memory_space<vmem>>, vector<1x1x2x128xf32>
    %284 = vector.shape_cast %283 : vector<1x1x2x128xf32> to vector<2x128xf32>
    %cst_119 = arith.constant dense<0.000000e+00> : vector<2x128xf32>
    %285 = tpu.matmul %272, %4, %cst_119 {dimension_numbers = #tpu.dot_dimension_numbers<[1], [0], [0], [1], [0, 0, 1, 1], [], []>} : vector<2x32xf32>, vector<32x128xf32>, vector<2x128xf32> -> vector<2x128xf32>
    %286 = arith.addf %284, %285 : vector<2x128xf32>
    %287 = vector.extract_strided_slice %286 {offsets = [0, 0], sizes = [2, 32], strides = [1, 1]} : vector<2x128xf32> to vector<2x32xf32>
    %cst_120 = arith.constant 5.000000e-01 : f32
    %288 = vector.broadcast %cst_120 : f32 to vector<2x32xf32>
    %289 = arith.mulf %288, %287 : vector<2x32xf32>
    %290 = math.tanh %289 : vector<2x32xf32>
    %cst_121 = arith.constant 1.000000e+00 : f32
    %291 = vector.broadcast %cst_121 : f32 to vector<2x32xf32>
    %292 = arith.addf %290, %291 : vector<2x32xf32>
    %cst_122 = arith.constant 5.000000e-01 : f32
    %293 = vector.broadcast %cst_122 : f32 to vector<2x32xf32>
    %294 = arith.mulf %293, %292 : vector<2x32xf32>
    %295 = vector.extract_strided_slice %286 {offsets = [0, 32], sizes = [2, 32], strides = [1, 1]} : vector<2x128xf32> to vector<2x32xf32>
    %cst_123 = arith.constant 5.000000e-01 : f32
    %296 = vector.broadcast %cst_123 : f32 to vector<2x32xf32>
    %297 = arith.mulf %296, %295 : vector<2x32xf32>
    %298 = math.tanh %297 : vector<2x32xf32>
    %cst_124 = arith.constant 1.000000e+00 : f32
    %299 = vector.broadcast %cst_124 : f32 to vector<2x32xf32>
    %300 = arith.addf %298, %299 : vector<2x32xf32>
    %cst_125 = arith.constant 5.000000e-01 : f32
    %301 = vector.broadcast %cst_125 : f32 to vector<2x32xf32>
    %302 = arith.mulf %301, %300 : vector<2x32xf32>
    %303 = vector.extract_strided_slice %286 {offsets = [0, 64], sizes = [2, 32], strides = [1, 1]} : vector<2x128xf32> to vector<2x32xf32>
    %304 = math.tanh %303 : vector<2x32xf32>
    %305 = vector.extract_strided_slice %286 {offsets = [0, 96], sizes = [2, 32], strides = [1, 1]} : vector<2x128xf32> to vector<2x32xf32>
    %cst_126 = arith.constant 5.000000e-01 : f32
    %306 = vector.broadcast %cst_126 : f32 to vector<2x32xf32>
    %307 = arith.mulf %306, %305 : vector<2x32xf32>
    %308 = math.tanh %307 : vector<2x32xf32>
    %cst_127 = arith.constant 1.000000e+00 : f32
    %309 = vector.broadcast %cst_127 : f32 to vector<2x32xf32>
    %310 = arith.addf %308, %309 : vector<2x32xf32>
    %cst_128 = arith.constant 5.000000e-01 : f32
    %311 = vector.broadcast %cst_128 : f32 to vector<2x32xf32>
    %312 = arith.mulf %311, %310 : vector<2x32xf32>
    %313 = arith.mulf %302, %270 : vector<2x32xf32>
    %314 = arith.mulf %294, %304 : vector<2x32xf32>
    %315 = arith.addf %313, %314 : vector<2x32xf32>
    %316 = math.tanh %315 : vector<2x32xf32>
    %317 = arith.mulf %312, %316 : vector<2x32xf32>
    %c0_129 = arith.constant 0 : index
    %318 = arith.index_cast %281 : i32 to index
    %c0_130 = arith.constant 0 : index
    %c0_131 = arith.constant 0 : index
    %319 = vector.load %arg4[%c0_129, %318, %c0_130, %c0_131] : memref<1x8x2x32xf32, #tpu.memory_space<vmem>>, vector<1x1x2x32xf32>
    %320 = vector.shape_cast %319 : vector<1x1x2x32xf32> to vector<2x32xf32>
    %321 = vector.shape_cast %317 : vector<2x32xf32> to vector<1x1x2x32xf32>
    tpu.vector_store %arg4[%c0_129, %318, %c0_130, %c0_131], %321 {strides = array<i32>} : memref<1x8x2x32xf32, #tpu.memory_space<vmem>>, vector<1x1x2x32xf32>,
    %c7_i32_132 = arith.constant 7 : i32
    %c7_i32_133 = arith.constant 7 : i32
    %322 = arith.subi %c7_i32_133, %c7_i32_132 : i32
    %323 = arith.muli %arg0, %322 : i32
    %c1_i32_134 = arith.constant 1 : i32
    %324 = arith.subi %c1_i32_134, %arg0 : i32
    %325 = arith.muli %324, %c7_i32_132 : i32
    %326 = arith.addi %323, %325 : i32
    %c0_135 = arith.constant 0 : index
    %327 = arith.index_cast %326 : i32 to index
    %c0_136 = arith.constant 0 : index
    %c0_137 = arith.constant 0 : index
    %328 = vector.load %arg2[%c0_135, %327, %c0_136, %c0_137] : memref<1x8x2x128xf32, #tpu.memory_space<vmem>>, vector<1x1x2x128xf32>
    %329 = vector.shape_cast %328 : vector<1x1x2x128xf32> to vector<2x128xf32>
    %cst_138 = arith.constant dense<0.000000e+00> : vector<2x128xf32>
    %330 = tpu.matmul %317, %4, %cst_138 {dimension_numbers = #tpu.dot_dimension_numbers<[1], [0], [0], [1], [0, 0, 1, 1], [], []>} : vector<2x32xf32>, vector<32x128xf32>, vector<2x128xf32> -> vector<2x128xf32>
    %331 = arith.addf %329, %330 : vector<2x128xf32>
    %332 = vector.extract_strided_slice %331 {offsets = [0, 0], sizes = [2, 32], strides = [1, 1]} : vector<2x128xf32> to vector<2x32xf32>
    %cst_139 = arith.constant 5.000000e-01 : f32
    %333 = vector.broadcast %cst_139 : f32 to vector<2x32xf32>
    %334 = arith.mulf %333, %332 : vector<2x32xf32>
    %335 = math.tanh %334 : vector<2x32xf32>
    %cst_140 = arith.constant 1.000000e+00 : f32
    %336 = vector.broadcast %cst_140 : f32 to vector<2x32xf32>
    %337 = arith.addf %335, %336 : vector<2x32xf32>
    %cst_141 = arith.constant 5.000000e-01 : f32
    %338 = vector.broadcast %cst_141 : f32 to vector<2x32xf32>
    %339 = arith.mulf %338, %337 : vector<2x32xf32>
    %340 = vector.extract_strided_slice %331 {offsets = [0, 32], sizes = [2, 32], strides = [1, 1]} : vector<2x128xf32> to vector<2x32xf32>
    %cst_142 = arith.constant 5.000000e-01 : f32
    %341 = vector.broadcast %cst_142 : f32 to vector<2x32xf32>
    %342 = arith.mulf %341, %340 : vector<2x32xf32>
    %343 = math.tanh %342 : vector<2x32xf32>
    %cst_143 = arith.constant 1.000000e+00 : f32
    %344 = vector.broadcast %cst_143 : f32 to vector<2x32xf32>
    %345 = arith.addf %343, %344 : vector<2x32xf32>
    %cst_144 = arith.constant 5.000000e-01 : f32
    %346 = vector.broadcast %cst_144 : f32 to vector<2x32xf32>
    %347 = arith.mulf %346, %345 : vector<2x32xf32>
    %348 = vector.extract_strided_slice %331 {offsets = [0, 64], sizes = [2, 32], strides = [1, 1]} : vector<2x128xf32> to vector<2x32xf32>
    %349 = math.tanh %348 : vector<2x32xf32>
    %350 = vector.extract_strided_slice %331 {offsets = [0, 96], sizes = [2, 32], strides = [1, 1]} : vector<2x128xf32> to vector<2x32xf32>
    %cst_145 = arith.constant 5.000000e-01 : f32
    %351 = vector.broadcast %cst_145 : f32 to vector<2x32xf32>
    %352 = arith.mulf %351, %350 : vector<2x32xf32>
    %353 = math.tanh %352 : vector<2x32xf32>
    %cst_146 = arith.constant 1.000000e+00 : f32
    %354 = vector.broadcast %cst_146 : f32 to vector<2x32xf32>
    %355 = arith.addf %353, %354 : vector<2x32xf32>
    %cst_147 = arith.constant 5.000000e-01 : f32
    %356 = vector.broadcast %cst_147 : f32 to vector<2x32xf32>
    %357 = arith.mulf %356, %355 : vector<2x32xf32>
    %358 = arith.mulf %347, %315 : vector<2x32xf32>
    %359 = arith.mulf %339, %349 : vector<2x32xf32>
    %360 = arith.addf %358, %359 : vector<2x32xf32>
    %361 = math.tanh %360 : vector<2x32xf32>
    %362 = arith.mulf %357, %361 : vector<2x32xf32>
    %c0_148 = arith.constant 0 : index
    %363 = arith.index_cast %326 : i32 to index
    %c0_149 = arith.constant 0 : index
    %c0_150 = arith.constant 0 : index
    %364 = vector.load %arg4[%c0_148, %363, %c0_149, %c0_150] : memref<1x8x2x32xf32, #tpu.memory_space<vmem>>, vector<1x1x2x32xf32>
    %365 = vector.shape_cast %364 : vector<1x1x2x32xf32> to vector<2x32xf32>
    %366 = vector.shape_cast %362 : vector<2x32xf32> to vector<1x1x2x32xf32>
    tpu.vector_store %arg4[%c0_148, %363, %c0_149, %c0_150], %366 {strides = array<i32>} : memref<1x8x2x32xf32, #tpu.memory_space<vmem>>, vector<1x1x2x32xf32>,
    %c8_i32 = arith.constant 8 : i32
    %c0_151 = arith.constant 0 : index
    %c0_152 = arith.constant 0 : index
    %367 = vector.load %arg5[%c0_151, %c0_152] : memref<2x32xf32, #tpu.memory_space<vmem>>, vector<2x32xf32>
    tpu.vector_store %arg5[%c0_151, %c0_152], %362 {strides = array<i32>} : memref<2x32xf32, #tpu.memory_space<vmem>>, vector<2x32xf32>,
    %c0_153 = arith.constant 0 : index
    %c0_154 = arith.constant 0 : index
    %368 = vector.load %arg6[%c0_153, %c0_154] : memref<2x32xf32, #tpu.memory_space<vmem>>, vector<2x32xf32>
    tpu.vector_store %arg6[%c0_153, %c0_154], %360 {strides = array<i32>} : memref<2x32xf32, #tpu.memory_space<vmem>>, vector<2x32xf32>,
    return
  }
  func.func @transform_0(%arg0: i32, %arg1: i32) -> (i32, i32, i32, i32) {
    %c0_i32 = arith.constant 0 : i32
    %0 = arith.subi %c0_i32, %arg1 : i32
    %1 = arith.muli %arg0, %0 : i32
    %c1_i32 = arith.constant 1 : i32
    %2 = arith.subi %c1_i32, %arg0 : i32
    %3 = arith.muli %2, %arg1 : i32
    %4 = arith.addi %1, %3 : i32
    %c0_i32_0 = arith.constant 0 : i32
    %c0_i32_1 = arith.constant 0 : i32
    %c0_i32_2 = arith.constant 0 : i32
    return %arg0, %4, %c0_i32_0, %c0_i32_1 : i32, i32, i32, i32
  }
  func.func @transform_1(%arg0: i32, %arg1: i32) -> (i32, i32, i32) {
    %c0_i32 = arith.constant 0 : i32
    %c0_i32_0 = arith.constant 0 : i32
    %c0_i32_1 = arith.constant 0 : i32
    return %arg0, %c0_i32, %c0_i32_0 : i32, i32, i32
  }
  func.func @transform_2(%arg0: i32, %arg1: i32) -> (i32, i32, i32, i32) {
    %c0_i32 = arith.constant 0 : i32
    %0 = arith.subi %c0_i32, %arg1 : i32
    %1 = arith.muli %arg0, %0 : i32
    %c1_i32 = arith.constant 1 : i32
    %2 = arith.subi %c1_i32, %arg0 : i32
    %3 = arith.muli %2, %arg1 : i32
    %4 = arith.addi %1, %3 : i32
    %c0_i32_0 = arith.constant 0 : i32
    %c0_i32_1 = arith.constant 0 : i32
    %c0_i32_2 = arith.constant 0 : i32
    return %arg0, %4, %c0_i32_0, %c0_i32_1 : i32, i32, i32, i32
  }
}

</mosaic_0001>

<bundles_post_ra>
// kernel: simple_lstm_forward.1
= control target key start
LH: loop header
LB: loop body
LE: loop exit
PB: predicated region body
PF: predicated region fallthrough
CT: control target
= control target key end

     0   :  { %s1603_s9 = smov 0   ;;  %s1605_s10 = smov 0   ;;  %s1839_s0 = inlined_call_operand.vmem [shape: f32[2,8,2,128], index: 0, kind: input, shape index: {}]   ;;  %s1840_s1 = inlined_call_operand.vmem [shape: f32[2,32,128], index: 1, kind: input, shape index: {}]   ;;  %s1841_s2 = inlined_call_operand.vmem [shape: f32[2,8,2,32], index: 2, kind: output, shape index: {}]  }
   0x1   :  { %s1607_s11 = smov 0  }
   0x2 LB: > { %s24_s12 = sadd.s32 1, %s1577_s10  ;;  %p1322_p0 = scmp.ge.s32.totalorder %s1581_s11, 1  ;;  %s1581_s11 = sphi %s1607_s11, %s12_s11   ;;  %s1577_s10 = sphi %s1605_s10, %s1843_s10   ;;  %s1573_s9 = sphi %s1603_s9, %s1842_s9  }
   0x3   : > { %p26_p1 = scmp.ge.s32.totalorder %s24_s12, 2  ;;  %p173_p2 = scmp.lt.s32.totalorder %s1581_s11, 3 }
   0x5   : > { %s1845_s12 = smov (%p26_p1, %s24_s12), 0  ;;  %p174_p3 = pnand %p1322_p0, %p173_p2 }
   0x6   : > { %p224_p4 = scmp.lt.s32.totalorder (!%p174_p3), %s1573_s9, 1  ;;  %s1329_s19 = smul.u32 (!%p174_p3), 14, %s1573_s9 }
   0x7   : > { %177 = sbr.rel (%p174_p3) target bundleno = 5537 (0x15a1), region = 28  ;;  %s1585_s24 = smov (!%p174_p3), 64  }
   0x8   : > { %s1586_s25 = smov (!%p174_p3), 32   ;;  %s388_s30 = smul.u32 (!%p174_p3), 6, %s1573_s9 }
   0x9   : > { %s1717_s3 = ssub.s32 (!%p174_p3), 1, %s1573_s9  ;;  %s495_s8 = smul.u32 (!%p174_p3), 5, %s1573_s9 }
   0xa   : > { %s390_s4 = sadd.s32 (!%p174_p3), %s1717_s3, %s388_s30  ;;  %s709_s27 = smul.u32 (!%p174_p3), 3, %s1573_s9 }
   0xb   : > { %s1331_s5 = sshll.u32 (!%p174_p3), %s390_s4, 1 }
   0xc   : > { %vm267_vm0 = vcmask 254976   ;;  %v1583_v0 = vmov 0.0   ;;  %vm1584_vm1 = vmmov 0   ;;  %s1632_s13 = scalar_select %p224_p4, %s1573_s9, 1  ;;  %vm280_vm2 = vcmask 261120  }
   0xd   : > { %1394 = vmatprep.subr.mxu0 %v1583_v0  ;;  %1402 = vmatprep.mubr.msk.f32.mxu0 %vm1584_vm1, %v1583_v0  ;;  %268 = vst.msk [vmem:[#allocation2] sm:$0x3] %vm267_vm0, %v1583_v0  ;;  %269 = vst.msk [vmem:[#allocation3] sm:$0x3] %vm267_vm0, %v1583_v0 }
   0xe   : > { %1405 = vmatprep.subr.mxu1 %v1583_v0  ;;  %1413 = vmatprep.mubr.msk.f32.mxu1 %vm1584_vm1, %v1583_v0  ;;  %s1352_s14 = sshll.u32 %s1632_s13, 5  ;;  %s1351_s18 = sshll.u32 %s1632_s13, 4 }
   0xf   : > { %s242_s17 = scalar_lea.vmem %s1840_s1, %s1352_s14  ;;  %s1683_s22 = scalar_lea.vmem %s1839_s0, %s1351_s18 }
  0x10   : > { %v1641_v1 = vld [vmem:[%s242_s17 + $0x18] sm:$0xff]  ;;  %v1643_v2 = vld [vmem:[%s242_s17 + $0x10] sm:$0xff]  ;;  %v1648_v3 = vld [vmem:[%s242_s17 + $0x8] sm:$0xff]  ;;  %s278_s23 = scalar_lea.vmem %s1683_s22, %s1329_s19  ;;  %s1698_s28 = scalar_lea.vmem %s1841_s2, %s1351_s18 }
  0x11   : > { %1395 = vmatpush3.msra.mxu0 %v1641_v1  ;;  %1406 = vmatpush3.msra.mxu1 %v1641_v1  ;;  %v1654_v4 = vld [vmem:[%s242_s17] sm:$0xff]  ;;  %s385_s29 = scalar_lea.vmem %s1698_s28, %s1329_s19  ;;  %s392_s6 = scalar_lea.vmem %s1683_s22, %s1331_s5 }
  0x12   : > { %1396 = vmatprep.subr.mxu0 %v1583_v0  ;;  %1407 = vmatprep.subr.mxu1 %v1583_v0  ;;  %v279_v6 = vld [vmem:[%s278_s23] sm:$0x3]  ;;  %s493_s7 = scalar_lea.vmem %s1698_s28, %s1331_s5  ;;  %s1333_s13 = sshll.u32 %s1717_s3, 1 }
  0x13   : > { %1397 = vmatpush3.msra.mxu0 %v1643_v2  ;;  %1408 = vmatpush3.msra.mxu1 %v1643_v2  ;;  %v393_v26 = vld [vmem:[%s392_s6] sm:$0x3]  ;;  %s497_s14 = sadd.s32 %s1333_s13, %s495_s8  ;;  %s603_s18 = smul.u32 3, %s1717_s3 }
  0x14   : > { %1398 = vmatprep.subr.mxu0 %v1583_v0  ;;  %1409 = vmatprep.subr.mxu1 %v1583_v0  ;;  %v274_v5 = vld [vmem:[#allocation2] sm:$0x3]  ;;  %v275_v11 = vld [vmem:[#allocation3] sm:$0x3]  ;;  %s1334_s15 = sshll.u32 %s497_s14, 1  ;;  %s1336_s19 = sshll.u32 %s1573_s9, 2 }
  0x15   : > { %1399 = vmatpush3.msra.mxu0 %v1648_v3  ;;  %1410 = vmatpush3.msra.mxu1 %v1648_v3  ;;  %s499_s16 = scalar_lea.vmem %s1683_s22, %s1334_s15  ;;  %s600_s17 = scalar_lea.vmem %s1698_s28, %s1334_s15 }
  0x16   : > { %1400 = vmatprep.subr.mxu0 %v1583_v0  ;;  %1411 = vmatprep.subr.mxu1 %v1583_v0  ;;  %v500_v44 = vld [vmem:[%s499_s16] sm:$0x3]  ;;  %s604_s20 = sadd.s32 %s1336_s19, %s603_s18  ;;  %s1342_s8 = sshll.u32 %s1573_s9, 1 }
  0x17   : > { %1401 = vmatpush3.msra.mxu0 %v1654_v4  ;;  %1412 = vmatpush3.msra.mxu1 %v1654_v4  ;;  %s1337_s21 = sshll.u32 %s604_s20, 1 }
  0x18   : > { %1403 = vmatmul.mubr.msk.f32.vlgmr.msra.gmra.mxu0 %vm280_vm2, %v274_v5  ;;  %1416 = vmatprep.subr.mxu0 %v1583_v0  ;;  %s606_s23 = scalar_lea.vmem %s1683_s22, %s1337_s21  ;;  %s707_s26 = scalar_lea.vmem %s1698_s28, %s1337_s21 }
  0x19   : > { %1417 = vmatpush3.msra.mxu0 %v1641_v1  ;;  %1424 = vmatprep.mubr.msk.f32.mxu0 %vm1584_vm1, %v1583_v0  ;;  %v607_v62 = vld [vmem:[%s606_s23] sm:$0x3]  ;;  %s1347_s21 = smul.u32 14, %s1717_s3 }
  0x1a   : > { %1418 = vmatprep.subr.mxu0 %v1583_v0  ;;  %1427 = vmatprep.subr.mxu1 %v1583_v0 }
  0x1b   : > { %1419 = vmatpush3.msra.mxu0 %v1643_v2  ;;  %s1031_s23 = scalar_lea.vmem %s1683_s22, %s1347_s21 }
  0x1c   : > { %1420 = vmatprep.subr.mxu0 %v1583_v0 }
  0x1d   : > { %1421 = vmatpush3.msra.mxu0 %v1648_v3 }
  0x1e   : > { %1422 = vmatprep.subr.mxu0 %v1583_v0 }
  0x1f   : > { %1423 = vmatpush3.msra.mxu0 %v1654_v4 }
  0x20   : > { %1438 = vmatprep.subr.mxu0 %v1583_v0 }
  0xd8   : > { %v350_v7 = vpop.f32.mrf.mxu0 }
  0xd9   : > { %v354_v8 = vadd.f32 %v350_v7, %v279_v6 }
  0xda   : > { %v1404_v9 = vpop.f32.mrf.mxu0 }
  0xdb   : > { %1511 = vtanh.f32 %v354_v8  ;;  %v355_v12 = vmul.f32 0.5, %v354_v8 }
  0xdd   : > { %1513 = vtanh.f32 %v355_v12 }
  0xe8   : > { %v1512_v10 = vpop.eup %1511 }
  0xe9   : > { %366 = vrot.lane.b32.xlu0 %v1512_v10, %s1585_s24 }
  0xea   : > { %v1514_v13 = vpop.eup %1513 }
  0xeb   : > { %v357_v14 = vadd.f32 1.0, %v1514_v13 }
  0xed   : > { %361 = vrot.lane.b32.xlu0 %v275_v11, %s1586_s25  ;;  %v358_v15 = vmul.f32 0.5, %v357_v14 }
 0x15b   : > { %v367_v16 = vpop.permute.xlu0 %366 }
 0x15c   : > { %v369_v17 = vmul.f32 %v367_v16, %v358_v15 }
 0x15e   : > { %371 = vrot.lane.b32.xlu1 %v369_v17, %s1586_s25 }
 0x15f   : > { %v362_v18 = vpop.permute.xlu0 %361 }
 0x160   : > { %v364_v19 = vmul.f32 %v362_v18, %v358_v15 }
 0x1d0   : > { %v372_v20 = vpop.permute.xlu1 %371 }
 0x1d1   : > { %v374_v21 = vadd.f32 %v372_v20, %v364_v19 }
 0x1d3   : > { %1515 = vtanh.f32 %v374_v21 }
 0x1e0   : > { %v1516_v22 = vpop.eup %1515 }
 0x1e1   : > { %377 = vrot.lane.b32.xlu1 %v1516_v22, %s1585_s24 }
 0x253   : > { %v378_v23 = vpop.permute.xlu1 %377 }
 0x254   : > { %v380_v24 = vmul.f32 %v378_v23, %v358_v15 }
 0x256   : > { %382 = vrot.lane.b32.xlu0 %v380_v24, %s1586_s25 }
 0x2c8   : > { %v383_v25 = vpop.permute.xlu0 %382 }
 0x2c9   : > { %387 = vst.msk [vmem:[%s385_s29] sm:$0x3] %vm267_vm0, %v383_v25  ;;  %1414 = vmatmul.mubr.msk.f32.vlgmr.msra.gmra.mxu1 %vm280_vm2, %v383_v25  ;;  %s1339_s29 = sshll.u32 %s1717_s3, 2 }
 0x2ca   : > { %1428 = vmatpush3.msra.mxu1 %v1641_v1  ;;  %1435 = vmatprep.mubr.msk.f32.mxu1 %vm1584_vm1, %v1583_v0  ;;  %s711_s30 = sadd.s32 %s1339_s29, %s709_s27 }
 0x2cb   : > { %1429 = vmatprep.subr.mxu1 %v1583_v0  ;;  %s1340_s4 = sshll.u32 %s711_s30, 1 }
 0x2cc   : > { %1430 = vmatpush3.msra.mxu1 %v1643_v2  ;;  %s713_s5 = scalar_lea.vmem %s1683_s22, %s1340_s4  ;;  %s814_s6 = scalar_lea.vmem %s1698_s28, %s1340_s4 }
 0x2cd   : > { %1431 = vmatprep.subr.mxu1 %v1583_v0 }
 0x2ce   : > { %1432 = vmatpush3.msra.mxu1 %v1648_v3 }
 0x2cf   : > { %1433 = vmatprep.subr.mxu1 %v1583_v0 }
 0x2d0   : > { %1434 = vmatpush3.msra.mxu1 %v1654_v4 }
 0x2d1   : > { %1449 = vmatprep.subr.mxu1 %v1583_v0 }
 0x389   : > { %v462_v27 = vpop.f32.mrf.mxu1 }
 0x38a   : > { %v466_v28 = vadd.f32 %v462_v27, %v393_v26 }
 0x38b   : > { %v1415_v29 = vpop.f32.mrf.mxu1 }
 0x38c   : > { %1517 = vtanh.f32 %v466_v28  ;;  %v467_v31 = vmul.f32 0.5, %v466_v28 }
 0x38e   : > { %1519 = vtanh.f32 %v467_v31 }
 0x399   : > { %v1518_v30 = vpop.eup %1517 }
 0x39a   : > { %474 = vrot.lane.b32.xlu1 %v1518_v30, %s1585_s24 }
 0x39b   : > { %v1520_v32 = vpop.eup %1519 }
 0x39c   : > { %v469_v33 = vadd.f32 1.0, %v1520_v32 }
 0x39e   : > { %v470_v34 = vmul.f32 0.5, %v469_v33 }
 0x3a0   : > { %v472_v37 = vmul.f32 %v470_v34, %v374_v21  ;;  %v714_v21 = vld [vmem:[%s713_s5] sm:$0x3] }
 0x40c   : > { %v475_v35 = vpop.permute.xlu1 %474 }
 0x40d   : > { %v477_v36 = vmul.f32 %v475_v35, %v470_v34 }
 0x40f   : > { %479 = vrot.lane.b32.xlu0 %v477_v36, %s1586_s25 }
 0x481   : > { %v480_v38 = vpop.permute.xlu0 %479 }
 0x482   : > { %v482_v39 = vadd.f32 %v480_v38, %v472_v37 }
 0x484   : > { %1521 = vtanh.f32 %v482_v39 }
 0x491   : > { %v1522_v40 = vpop.eup %1521 }
 0x492   : > { %485 = vrot.lane.b32.xlu1 %v1522_v40, %s1585_s24 }
 0x504   : > { %v486_v41 = vpop.permute.xlu1 %485 }
 0x505   : > { %v488_v42 = vmul.f32 %v486_v41, %v470_v34 }
 0x507   : > { %490 = vrot.lane.b32.xlu0 %v488_v42, %s1586_s25 }
 0x579   : > { %v491_v43 = vpop.permute.xlu0 %490 }
 0x57a   : > { %494 = vst.msk [vmem:[%s493_s7] sm:$0x3] %vm267_vm0, %v491_v43  ;;  %1425 = vmatmul.mubr.msk.f32.vlgmr.msra.gmra.mxu0 %vm280_vm2, %v491_v43  ;;  %s817_s7 = smul.u32 5, %s1717_s3 }
 0x57b   : > { %1439 = vmatpush3.msra.mxu0 %v1641_v1  ;;  %1446 = vmatprep.mubr.msk.f32.mxu0 %vm1584_vm1, %v1583_v0 }
 0x57c   : > { %1440 = vmatprep.subr.mxu0 %v1583_v0  ;;  %s818_s13 = sadd.s32 %s1342_s8, %s817_s7 }
 0x57d   : > { %1441 = vmatpush3.msra.mxu0 %v1643_v2  ;;  %s1343_s14 = sshll.u32 %s818_s13, 1 }
 0x57e   : > { %1442 = vmatprep.subr.mxu0 %v1583_v0  ;;  %s820_s15 = scalar_lea.vmem %s1683_s22, %s1343_s14  ;;  %s921_s16 = scalar_lea.vmem %s1698_s28, %s1343_s14 }
 0x57f   : > { %1443 = vmatpush3.msra.mxu0 %v1648_v3 }
 0x580   : > { %1444 = vmatprep.subr.mxu0 %v1583_v0 }
 0x581   : > { %1445 = vmatpush3.msra.mxu0 %v1654_v4 }
 0x582   : > { %1460 = vmatprep.subr.mxu0 %v1583_v0 }
 0x63a   : > { %v569_v45 = vpop.f32.mrf.mxu0 }
 0x63b   : > { %v573_v46 = vadd.f32 %v569_v45, %v500_v44 }
 0x63c   : > { %v1426_v47 = vpop.f32.mrf.mxu0 }
 0x63d   : > { %1523 = vtanh.f32 %v573_v46  ;;  %v574_v49 = vmul.f32 0.5, %v573_v46 }
 0x63f   : > { %1525 = vtanh.f32 %v574_v49 }
 0x64a   : > { %v1524_v48 = vpop.eup %1523 }
 0x64b   : > { %581 = vrot.lane.b32.xlu1 %v1524_v48, %s1585_s24 }
 0x64c   : > { %v1526_v50 = vpop.eup %1525 }
 0x64d   : > { %v576_v51 = vadd.f32 1.0, %v1526_v50 }
 0x64f   : > { %v577_v52 = vmul.f32 0.5, %v576_v51 }
 0x651   : > { %v579_v55 = vmul.f32 %v577_v52, %v482_v39 }
 0x6bd   : > { %v582_v53 = vpop.permute.xlu1 %581 }
 0x6be   : > { %v584_v54 = vmul.f32 %v582_v53, %v577_v52 }
 0x6c0   : > { %586 = vrot.lane.b32.xlu0 %v584_v54, %s1586_s25 }
 0x732   : > { %v587_v56 = vpop.permute.xlu0 %586 }
 0x733   : > { %v589_v57 = vadd.f32 %v587_v56, %v579_v55 }
 0x735   : > { %1527 = vtanh.f32 %v589_v57 }
 0x742   : > { %v1528_v58 = vpop.eup %1527 }
 0x743   : > { %592 = vrot.lane.b32.xlu1 %v1528_v58, %s1585_s24 }
 0x7b5   : > { %v593_v59 = vpop.permute.xlu1 %592 }
 0x7b6   : > { %v595_v60 = vmul.f32 %v593_v59, %v577_v52 }
 0x7b8   : > { %597 = vrot.lane.b32.xlu0 %v595_v60, %s1586_s25 }
 0x82a   : > { %v598_v61 = vpop.permute.xlu0 %597 }
 0x82b   : > { %601 = vst.msk [vmem:[%s600_s17] sm:$0x3] %vm267_vm0, %v598_v61  ;;  %1436 = vmatmul.mubr.msk.f32.vlgmr.msra.gmra.mxu1 %vm280_vm2, %v598_v61  ;;  %s923_s17 = smul.u32 6, %s1717_s3 }
 0x82c   : > { %1450 = vmatpush3.msra.mxu1 %v1641_v1  ;;  %1457 = vmatprep.mubr.msk.f32.mxu1 %vm1584_vm1, %v1583_v0 }
 0x82d   : > { %1451 = vmatprep.subr.mxu1 %v1583_v0  ;;  %s924_s18 = sadd.s32 %s1573_s9, %s923_s17 }
 0x82e   : > { %1452 = vmatpush3.msra.mxu1 %v1643_v2  ;;  %s1345_s19 = sshll.u32 %s924_s18, 1 }
 0x82f   : > { %1453 = vmatprep.subr.mxu1 %v1583_v0  ;;  %s926_s20 = scalar_lea.vmem %s1683_s22, %s1345_s19  ;;  %s1027_s9 = scalar_lea.vmem %s1698_s28, %s1345_s19 }
 0x830   : > { %1454 = vmatpush3.msra.mxu1 %v1648_v3  ;;  %v927_v52 = vld [vmem:[%s926_s20] sm:$0x3]  ;;  %s1587_s22 = smov 96  }
 0x831   : > { %1455 = vmatprep.subr.mxu1 %v1583_v0 }
 0x832   : > { %1456 = vmatpush3.msra.mxu1 %v1654_v4 }
 0x833   : > { %1471 = vmatprep.subr.mxu1 %v1583_v0 }
 0x8eb   : > { %v676_v63 = vpop.f32.mrf.mxu1 }
 0x8ec   : > { %v680_v5 = vadd.f32 %v676_v63, %v607_v62 }
 0x8ed   : > { %v1437_v6 = vpop.f32.mrf.mxu1 }
 0x8ee   : > { %1529 = vtanh.f32 %v680_v5  ;;  %v681_v8 = vmul.f32 0.5, %v680_v5 }
 0x8f0   : > { %1531 = vtanh.f32 %v681_v8 }
 0x8fb   : > { %v1530_v7 = vpop.eup %1529 }
 0x8fc   : > { %688 = vrot.lane.b32.xlu1 %v1530_v7, %s1585_s24 }
 0x8fd   : > { %v1532_v9 = vpop.eup %1531 }
 0x8fe   : > { %v683_v10 = vadd.f32 1.0, %v1532_v9 }
 0x900   : > { %v684_v11 = vmul.f32 0.5, %v683_v10 }
 0x902   : > { %v686_v14 = vmul.f32 %v684_v11, %v589_v57 }
 0x96e   : > { %v689_v12 = vpop.permute.xlu1 %688 }
 0x96f   : > { %v691_v13 = vmul.f32 %v689_v12, %v684_v11 }
 0x971   : > { %693 = vrot.lane.b32.xlu0 %v691_v13, %s1586_s25 }
 0x9e3   : > { %v694_v15 = vpop.permute.xlu0 %693 }
 0x9e4   : > { %v696_v16 = vadd.f32 %v694_v15, %v686_v14 }
 0x9e6   : > { %1533 = vtanh.f32 %v696_v16 }
 0x9f3   : > { %v1534_v17 = vpop.eup %1533 }
 0x9f4   : > { %699 = vrot.lane.b32.xlu1 %v1534_v17, %s1585_s24 }
 0xa66   : > { %v700_v18 = vpop.permute.xlu1 %699 }
 0xa67   : > { %v702_v19 = vmul.f32 %v700_v18, %v684_v11  ;;  %v1032_v11 = vld [vmem:[%s1031_s23] sm:$0x3] }
 0xa69   : > { %704 = vrot.lane.b32.xlu0 %v702_v19, %s1586_s25 }
 0xadb   : > { %v705_v20 = vpop.permute.xlu0 %704 }
 0xadc   : > { %708 = vst.msk [vmem:[%s707_s26] sm:$0x3] %vm267_vm0, %v705_v20  ;;  %1447 = vmatmul.mubr.msk.f32.vlgmr.msra.gmra.mxu0 %vm280_vm2, %v705_v20  ;;  %s1132_s26 = scalar_lea.vmem %s1698_s28, %s1347_s21 }
 0xadd   : > { %1461 = vmatpush3.msra.mxu0 %v1641_v1  ;;  %1468 = vmatprep.mubr.msk.f32.mxu0 %vm1584_vm1, %v1583_v0 }
 0xade   : > { %1462 = vmatprep.subr.mxu0 %v1583_v0 }
 0xadf   : > { %1463 = vmatpush3.msra.mxu0 %v1643_v2 }
 0xae0   : > { %1464 = vmatprep.subr.mxu0 %v1583_v0 }
 0xae1   : > { %1465 = vmatpush3.msra.mxu0 %v1648_v3 }
 0xae2   : > { %1466 = vmatprep.subr.mxu0 %v1583_v0 }
 0xae3   : > { %1467 = vmatpush3.msra.mxu0 %v1654_v4 }
 0xb9c   : > { %v783_v22 = vpop.f32.mrf.mxu0 }
 0xb9d   : > { %v787_v23 = vadd.f32 %v783_v22, %v714_v21 }
 0xb9e   : > { %v1448_v24 = vpop.f32.mrf.mxu0 }
 0xb9f   : > { %1535 = vtanh.f32 %v787_v23  ;;  %v788_v26 = vmul.f32 0.5, %v787_v23 }
 0xba1   : > { %1537 = vtanh.f32 %v788_v26 }
 0xbac   : > { %v1536_v25 = vpop.eup %1535 }
 0xbad   : > { %795 = vrot.lane.b32.xlu1 %v1536_v25, %s1585_s24 }
 0xbae   : > { %v1538_v27 = vpop.eup %1537 }
 0xbaf   : > { %v790_v28 = vadd.f32 1.0, %v1538_v27 }
 0xbb1   : > { %v791_v29 = vmul.f32 0.5, %v790_v28 }
 0xbb3   : > { %v793_v32 = vmul.f32 %v791_v29, %v696_v16 }
 0xc1f   : > { %v796_v30 = vpop.permute.xlu1 %795 }
 0xc20   : > { %v798_v31 = vmul.f32 %v796_v30, %v791_v29 }
 0xc22   : > { %800 = vrot.lane.b32.xlu0 %v798_v31, %s1586_s25 }
 0xc94   : > { %v801_v33 = vpop.permute.xlu0 %800 }
 0xc95   : > { %v803_v34 = vadd.f32 %v801_v33, %v793_v32 }
 0xc97   : > { %1539 = vtanh.f32 %v803_v34 }
 0xca4   : > { %v1540_v35 = vpop.eup %1539 }
 0xca5   : > { %806 = vrot.lane.b32.xlu1 %v1540_v35, %s1585_s24 }
 0xd17   : > { %v807_v36 = vpop.permute.xlu1 %806 }
 0xd18   : > { %v809_v37 = vmul.f32 %v807_v36, %v791_v29 }
 0xd1a   : > { %811 = vrot.lane.b32.xlu0 %v809_v37, %s1586_s25 }
 0xd8c   : > { %v812_v38 = vpop.permute.xlu0 %811 }
 0xd8d   : > { %815 = vst.msk [vmem:[%s814_s6] sm:$0x3] %vm267_vm0, %v812_v38  ;;  %1458 = vmatmul.mubr.msk.f32.vlgmr.msra.gmra.mxu1 %vm280_vm2, %v812_v38 }
 0xd8e   : > { %1472 = vmatpush3.msra.mxu1 %v1641_v1  ;;  %1479 = vmatprep.mubr.msk.f32.mxu1 %vm1584_vm1, %v1583_v0  ;;  %v821_v1 = vld [vmem:[%s820_s15] sm:$0x3] }
 0xd8f   : > { %1473 = vmatprep.subr.mxu1 %v1583_v0 }
 0xd90   : > { %1474 = vmatpush3.msra.mxu1 %v1643_v2 }
 0xd91   : > { %1475 = vmatprep.subr.mxu1 %v1583_v0 }
 0xd92   : > { %1476 = vmatpush3.msra.mxu1 %v1648_v3 }
 0xd93   : > { %1477 = vmatprep.subr.mxu1 %v1583_v0 }
 0xd94   : > { %1478 = vmatpush3.msra.mxu1 %v1654_v4 }
 0xe4d   : > { %v890_v39 = vpop.f32.mrf.mxu1 }
 0xe4e   : > { %v894_v40 = vadd.f32 %v890_v39, %v821_v1 }
 0xe4f   : > { %v1459_v41 = vpop.f32.mrf.mxu1 }
 0xe50   : > { %1541 = vtanh.f32 %v894_v40  ;;  %v895_v2 = vmul.f32 0.5, %v894_v40 }
 0xe52   : > { %1543 = vtanh.f32 %v895_v2 }
 0xe5d   : > { %v1542_v42 = vpop.eup %1541 }
 0xe5e   : > { %902 = vrot.lane.b32.xlu1 %v1542_v42, %s1585_s24 }
 0xe5f   : > { %v1544_v3 = vpop.eup %1543 }
 0xe60   : > { %v897_v0 = vadd.f32 1.0, %v1544_v3 }
 0xe62   : > { %v898_v43 = vmul.f32 0.5, %v897_v0 }
 0xe64   : > { %v900_v45 = vmul.f32 %v898_v43, %v803_v34 }
 0xed0   : > { %v903_v4 = vpop.permute.xlu1 %902 }
 0xed1   : > { %v905_v44 = vmul.f32 %v903_v4, %v898_v43 }
 0xed3   : > { %907 = vrot.lane.b32.xlu0 %v905_v44, %s1586_s25 }
 0xf45   : > { %v908_v46 = vpop.permute.xlu0 %907 }
 0xf46   : > { %v910_v47 = vadd.f32 %v908_v46, %v900_v45 }
 0xf48   : > { %1545 = vtanh.f32 %v910_v47 }
 0xf55   : > { %v1546_v48 = vpop.eup %1545 }
 0xf56   : > { %913 = vrot.lane.b32.xlu1 %v1546_v48, %s1585_s24 }
 0xfc8   : > { %v914_v49 = vpop.permute.xlu1 %913 }
 0xfc9   : > { %v916_v50 = vmul.f32 %v914_v49, %v898_v43 }
 0xfcb   : > { %918 = vrot.lane.b32.xlu0 %v916_v50, %s1586_s25 }
0x103d   : > { %v919_v51 = vpop.permute.xlu0 %918 }
0x103e   : > { %922 = vst.msk [vmem:[%s921_s16] sm:$0x3] %vm267_vm0, %v919_v51  ;;  %1469 = vmatmul.mubr.msk.f32.vlgmr.msra.gmra.mxu0 %vm280_vm2, %v919_v51 }
0x10fe   : > { %v996_v53 = vpop.f32.mrf.mxu0 }
0x10ff   : > { %v1000_v54 = vadd.f32 %v996_v53, %v927_v52 }
0x1100   : > { %v1470_v55 = vpop.f32.mrf.mxu0 }
0x1101   : > { %1547 = vtanh.f32 %v1000_v54  ;;  %v1001_v57 = vmul.f32 0.5, %v1000_v54 }
0x1103   : > { %1549 = vtanh.f32 %v1001_v57 }
0x110e   : > { %v1548_v56 = vpop.eup %1547 }
0x110f   : > { %1008 = vrot.lane.b32.xlu1 %v1548_v56, %s1585_s24 }
0x1110   : > { %v1550_v58 = vpop.eup %1549 }
0x1111   : > { %v1003_v59 = vadd.f32 1.0, %v1550_v58 }
0x1113   : > { %v1004_v60 = vmul.f32 0.5, %v1003_v59 }
0x1115   : > { %v1006_v63 = vmul.f32 %v1004_v60, %v910_v47 }
0x1181   : > { %v1009_v61 = vpop.permute.xlu1 %1008 }
0x1182   : > { %v1011_v62 = vmul.f32 %v1009_v61, %v1004_v60 }
0x1184   : > { %1013 = vrot.lane.b32.xlu0 %v1011_v62, %s1586_s25 }
0x11f6   : > { %v1014_v5 = vpop.permute.xlu0 %1013 }
0x11f7   : > { %v1016_v6 = vadd.f32 %v1014_v5, %v1006_v63 }
0x11f9   : > { %1551 = vtanh.f32 %v1016_v6 }
0x1206   : > { %v1552_v7 = vpop.eup %1551 }
0x1207   : > { %1019 = vrot.lane.b32.xlu1 %v1552_v7, %s1585_s24 }
0x1279   : > { %v1020_v8 = vpop.permute.xlu1 %1019 }
0x127a   : > { %v1022_v9 = vmul.f32 %v1020_v8, %v1004_v60 }
0x127c   : > { %1024 = vrot.lane.b32.xlu0 %v1022_v9, %s1586_s25 }
0x12ee   : > { %v1025_v10 = vpop.permute.xlu0 %1024 }
0x12ef   : > { %1028 = vst.msk [vmem:[%s1027_s9] sm:$0x3] %vm267_vm0, %v1025_v10  ;;  %1480 = vmatmul.mubr.msk.f32.vlgmr.msra.gmra.mxu1 %vm280_vm2, %v1025_v10 }
0x13af   : > { %v1101_v12 = vpop.f32.mrf.mxu1 }
0x13b0   : > { %v1105_v13 = vadd.f32 %v1101_v12, %v1032_v11 }
0x13b1   : > { %v1481_v14 = vpop.f32.mrf.mxu1 }
0x13b2   : > { %1553 = vtanh.f32 %v1105_v13  ;;  %v1106_v16 = vmul.f32 0.5, %v1105_v13 }
0x13b4   : > { %1555 = vtanh.f32 %v1106_v16 }
0x13bf   : > { %v1554_v15 = vpop.eup %1553 }
0x13c0   : > { %1113 = vrot.lane.b32.xlu1 %v1554_v15, %s1585_s24 }
0x13c1   : > { %v1556_v17 = vpop.eup %1555 }
0x13c2   : > { %v1108_v18 = vadd.f32 1.0, %v1556_v17 }
0x13c4   : > { %v1109_v19 = vmul.f32 0.5, %v1108_v18 }
0x13c6   : > { %v1111_v22 = vmul.f32 %v1109_v19, %v1016_v6 }
0x1432   : > { %v1114_v20 = vpop.permute.xlu1 %1113 }
0x1433   : > { %v1116_v21 = vmul.f32 %v1114_v20, %v1109_v19 }
0x1435   : > { %1118 = vrot.lane.b32.xlu0 %v1116_v21, %s1586_s25 }
0x14a7   : > { %v1119_v23 = vpop.permute.xlu0 %1118 }
0x14a8   : > { %v1121_v24 = vadd.f32 %v1119_v23, %v1111_v22 }
0x14aa   : > { %1557 = vtanh.f32 %v1121_v24 }
0x14b7   : > { %v1558_v25 = vpop.eup %1557 }
0x14b8   : > { %1124 = vrot.lane.b32.xlu1 %v1558_v25, %s1585_s24 }
0x14bc   : > { %1136 = vrot.lane.b32.xlu1 %v1121_v24, %s1587_s22 }
0x152a   : > { %v1125_v26 = vpop.permute.xlu1 %1124 }
0x152b   : > { %v1127_v27 = vmul.f32 %v1125_v26, %v1109_v19 }
0x152d   : > { %1129 = vrot.lane.b32.xlu0 %v1127_v27, %s1586_s25 }
0x152e   : > { %v1137_v28 = vpop.permute.xlu1 %1136 }
0x152f   : > { %1139 = vst.msk [vmem:[#allocation3] sm:$0x3] %vm267_vm0, %v1137_v28 }
0x159f   : > { %v1130_v29 = vpop.permute.xlu0 %1129 }
0x15a0   : > { %1133 = vst.msk [vmem:[%s1132_s26] sm:$0x3] %vm267_vm0, %v1130_v29  ;;  %1134 = vst.msk [vmem:[#allocation2] sm:$0x3] %vm267_vm0, %v1130_v29 }
0x15a1 PF: > { %s12_s11 = sadd.s32 1, %s1581_s11   ;;  %s1842_s9 = smov %s1577_s10 }
0x15a2   : > { %p9_p5 = scmp.ge.s32.totalorder %s12_s11, 4   ;;  %s1843_s10 = smov %s1845_s12 }
0x15a4   :  { %11 = sbr.rel (!%p9_p5) target bundleno = 2 (0x2), region = 81 }

</bundles_post_ra>
